<compile_context>
chip_gen: v7x
topology: tpu7x:2x2x1
jax: 0.10.0
libtpu: 0.0.40
codegen_flags: <defaults>
</compile_context>

<pallas_src>
import functools
import math

import jax
import jax.numpy as jnp
from jax import lax
from jax.experimental import pallas as pl
from jax.experimental.pallas import tpu as pltpu

FEAT_PAD = 128                  # lane-dense feature padding (128-lane vreg width)
NEG_INF = -1e30                 # finite mask value (keeps the online softmax NaN-free)
_VMEM_LIMIT = 32 * 1024 * 1024  # explicit scoped-VMEM budget (safe on v5e/v6e/v7x)


def _round_up(x, m):
    return (x + m - 1) // m * m


def _pick_row_tile(n_pad, cap=2048):
    # Projection kernel is purely mem-bound with tiny per-tile compute; use the biggest
    # row tile that divides n_pad (per-grid-step overhead ~0.35 us dominates at 128).
    for t in (2048, 1024, 512, 256, 128):
        if t <= cap and n_pad % t == 0:
            return t
    return n_pad


# ---------------------------------------------------------------------------
# Kernel A: feature projection + fused attention-score matmul (hoisted out of
# the N^2 attention loop).  h is emitted in bf16 (it is re-read once per dst tile).
# ---------------------------------------------------------------------------
def _gat_proj_kernel(x_ref, w_ref, att_ref, h_ref, s_ref, *, mxu_dtype):
    x = x_ref[...].astype(mxu_dtype)
    h = jnp.dot(x, w_ref[...], preferred_element_type=jnp.float32)       # [T, FEAT_PAD]
    s = jnp.dot(h.astype(mxu_dtype), att_ref[...],
                preferred_element_type=jnp.float32)                      # [T, 2*heads]
    h_ref[...] = h.astype(h_ref.dtype)
    s_ref[...] = s


def _gat_proj(x, w_pad, att_mat, *, row_tile, mxu_dtype, h_dtype):
    n_pad, fin = x.shape
    two_h = att_mat.shape[1]
    kernel = functools.partial(_gat_proj_kernel, mxu_dtype=mxu_dtype)
    return pl.pallas_call(
        kernel,
        out_shape=(jax.ShapeDtypeStruct((n_pad, FEAT_PAD), h_dtype),
                   jax.ShapeDtypeStruct((n_pad, two_h), jnp.float32)),
        grid_spec=pltpu.PrefetchScalarGridSpec(
            num_scalar_prefetch=0,
            grid=(n_pad // row_tile,),
            in_specs=[
                pl.BlockSpec((row_tile, fin), lambda i: (i, 0)),
                pl.BlockSpec((fin, FEAT_PAD), lambda i: (0, 0)),
                pl.BlockSpec((FEAT_PAD, two_h), lambda i: (0, 0)),
            ],
            out_specs=[
                pl.BlockSpec((row_tile, FEAT_PAD), lambda i: (i, 0)),
                pl.BlockSpec((row_tile, two_h), lambda i: (i, 0)),
            ],
        ),
        compiler_params=pltpu.CompilerParams(
            dimension_semantics=("parallel",),
            vmem_limit_bytes=_VMEM_LIMIT),
    )(x, w_pad, att_mat)


# ---------------------------------------------------------------------------
# Kernel B: tiled masked-softmax aggregation with online (flash-style) softmax.
# Grid = (dst tiles [parallel], src tiles [arbitrary / reduction]).
# ---------------------------------------------------------------------------
def _gat_attn_kernel(tbl_ref, adst_ref, asrcT_ref, h_ref, adj_ref, b_ref,
                     out_ref, m_sc, l_sc, acc_sc,
                     *, heads, out_dim, concat, apply_elu, mxu_dtype,
                     approx_recip):
    i = pl.program_id(0)
    j = pl.program_id(1)
    nj = pl.num_programs(1)
    td = acc_sc.shape[0]

    @pl.when(j == 0)
    def _init():
        m_sc[...] = jnp.full(m_sc.shape, NEG_INF, jnp.float32)
        l_sc[...] = jnp.zeros(l_sc.shape, jnp.float32)
        acc_sc[...] = jnp.zeros(acc_sc.shape, jnp.float32)

    # Block-occupancy skip: tbl[i*nj + j] == j  <=>  this (dst, src) block contains at
    # least one edge.  Empty blocks had their mask/h/a_src DMAs remapped to the previous
    # live block (so runs of empty blocks are not re-fetched) and are skipped here.
    is_live = tbl_ref[i * nj + j] == j

    col = lax.broadcasted_iota(jnp.int32, (1, FEAT_PAD), 1)

    @pl.when(is_live)
    def _compute():
        edge = adj_ref[...] != 0                      # [Td, Ts] bool (int8 0/1 in HBM)
        a_dst = adst_ref[...]                         # [Td, heads]   per-target score
        a_srcT = asrcT_ref[...]                       # [heads, Ts]   per-source score
        h_mx = h_ref[...].astype(mxu_dtype)           # [Ts, FEAT_PAD] (bf16 in HBM)
        m_prev = m_sc[...]                            # [Td, heads]
        l_prev = l_sc[...]

        agg_full = jnp.zeros((td, FEAT_PAD), jnp.float32)
        alpha_full = jnp.zeros((td, FEAT_PAD), jnp.float32)
        m_cols, a_cols, s_cols = [], [], []
        # heads is small (4 / 1); per-head temporaries (e, p) are consumed inside the
        # iteration so this static unroll does not grow vreg/VMEM live ranges.
        for hd in range(heads):
            lo = hd * out_dim
            sel = jnp.logical_and(col >= lo, col < lo + out_dim).astype(jnp.float32)
            e = a_dst[:, hd:hd + 1] + a_srcT[hd:hd + 1, :]           # [Td, Ts]
            e = jnp.where(e > 0, e, 0.2 * e)                         # leaky_relu(0.2)
            e = jnp.where(edge, e, NEG_INF)
            m_p = m_prev[:, hd:hd + 1]
            m_c = jnp.maximum(m_p, jnp.max(e, axis=-1, keepdims=True))
            alpha = jnp.exp(m_p - m_c)                               # [Td, 1]
            p = jnp.exp(e - m_c)                                     # [Td, Ts]
            s_cols.append(jnp.sum(p, axis=-1, keepdims=True))
            # Full 128-lane aggregation matmul (same MXU cost as an 8-lane-wide one),
            # masked into this head's lane block -> single lane-dense acc update below.
            agg = jnp.dot(p.astype(mxu_dtype), h_mx,
                          preferred_element_type=jnp.float32)        # [Td, FEAT_PAD]
            agg_full = agg_full + sel * agg
            alpha_full = alpha_full + sel * alpha
            m_cols.append(m_c)
            a_cols.append(alpha)

        # One full-width store each (no per-head masked sub-vreg RMW on scratch).
        m_sc[...] = jnp.concatenate(m_cols, axis=1)
        l_sc[...] = jnp.concatenate(a_cols, axis=1) * l_prev \
            + jnp.concatenate(s_cols, axis=1)
        # Padding lanes: alpha_full == agg_full == 0 there and acc is already 0.
        acc_sc[...] = alpha_full * acc_sc[...] + agg_full

    @pl.when(j == nj - 1)
    def _finalize():
        # Guard rows with no incident edge at all (cannot happen with self-loops, but
        # prevents inf*0 -> NaN in degenerate graphs).
        l = jnp.maximum(l_sc[...], 1e-20)             # [Td, heads]
        inv = pl.reciprocal(l, approx=True) if approx_recip else 1.0 / l
        if concat:
            inv_full = jnp.zeros((td, FEAT_PAD), jnp.float32)
            for hd in range(heads):
                lo = hd * out_dim
                sel = jnp.logical_and(col >= lo, col < lo + out_dim).astype(jnp.float32)
                inv_full = inv_full + sel * inv[:, hd:hd + 1]
            res = acc_sc[...] * inv_full + b_ref[...]
        else:
            summed = jnp.zeros((td, out_dim), jnp.float32)
            for hd in range(heads):
                lo = hd * out_dim
                summed = summed + acc_sc[:, lo:lo + out_dim] * inv[:, hd:hd + 1]
            small = summed * (1.0 / heads) + b_ref[...][:, :out_dim]
            res = jnp.concatenate(
                [small, jnp.zeros((td, FEAT_PAD - out_dim), jnp.float32)], axis=-1)
        if apply_elu:
            res = jnp.where(res > 0, res, jnp.exp(jnp.minimum(res, 0.0)) - 1.0)
        out_ref[...] = res.astype(out_ref.dtype)


def gat_conv(x_pad, adj_i8, eff_tbl, w, att_src, att_dst, b, *, heads, out_dim,
             concat, apply_elu, dst_tile, src_tile,
             mxu_dtype=jnp.bfloat16, out_dtype=jnp.float32, approx_recip=True):
    """One GATConv layer (dense masked softmax), tiled over dst x src node blocks.

    x_pad:   [N_pad, Fx]      node features (Fx may already be lane-padded)
    adj_i8:  [N_pad, N_pad]   int8 adjacency (1 for edge j->i, incl. self loops)
    eff_tbl: [ni*nj]          int32 effective-src-block table (block skip / DMA remap)
    Returns [N_pad, FEAT_PAD] lane-padded with zeros, dtype out_dtype.
    """
    n_pad, fin_pad = x_pad.shape
    hd_feat = heads * out_dim
    assert hd_feat <= FEAT_PAD and out_dim <= FEAT_PAD
    assert n_pad % dst_tile == 0 and n_pad % src_tile == 0

    fin_logical = w.shape[0]
    assert fin_logical <= fin_pad

    # Zero-pad the weight to the lane-padded input width / FEAT_PAD output lanes;
    # store directly in the MXU dtype so the kernel does no per-step cast.
    w_pad = jnp.zeros((fin_pad, FEAT_PAD), mxu_dtype)
    w_pad = w_pad.at[:fin_logical, :hd_feat].set(w.astype(mxu_dtype))

    # Block-diagonal attention matrix: scores = h @ att_mat gives columns
    # [a_src head 0..H-1 | a_dst head 0..H-1] in a single MXU matmul.
    att_mat = jnp.zeros((FEAT_PAD, 2 * heads), jnp.float32)
    for hd in range(heads):
        att_mat = att_mat.at[hd * out_dim:(hd + 1) * out_dim, hd].set(
            att_src[hd].astype(jnp.float32))
        att_mat = att_mat.at[hd * out_dim:(hd + 1) * out_dim, heads + hd].set(
            att_dst[hd].astype(jnp.float32))
    att_mat = att_mat.astype(mxu_dtype)

    row_tile = _pick_row_tile(n_pad)
    h_pad, scores = _gat_proj(x_pad, w_pad, att_mat, row_tile=row_tile,
                              mxu_dtype=mxu_dtype, h_dtype=jnp.bfloat16)

    a_dst = scores[:, heads:2 * heads]            # [N_pad, heads]
    a_srcT = jnp.transpose(scores[:, :heads])     # [heads, N_pad] (lane = source node)

    out_feat = hd_feat if concat else out_dim
    b_pad = jnp.zeros((1, FEAT_PAD), jnp.float32).at[0, :out_feat].set(
        b.reshape(-1).astype(jnp.float32))

    ni = n_pad // dst_tile
    nj = n_pad // src_tile
    kernel = functools.partial(_gat_attn_kernel, heads=heads, out_dim=out_dim,
                               concat=concat, apply_elu=apply_elu,
                               mxu_dtype=mxu_dtype, approx_recip=approx_recip)
    out_pad = pl.pallas_call(
        kernel,
        out_shape=jax.ShapeDtypeStruct((n_pad, FEAT_PAD), out_dtype),
        grid_spec=pltpu.PrefetchScalarGridSpec(
            num_scalar_prefetch=1,
            grid=(ni, nj),
            in_specs=[
                pl.BlockSpec((dst_tile, heads), lambda i, j, t: (i, 0)),      # a_dst
                pl.BlockSpec((heads, src_tile),                                # a_src^T
                             lambda i, j, t: (0, t[i * nj + j])),
                pl.BlockSpec((src_tile, FEAT_PAD),                             # h (src)
                             lambda i, j, t: (t[i * nj + j], 0)),
                pl.BlockSpec((dst_tile, src_tile),                             # adj int8
                             lambda i, j, t: (i, t[i * nj + j])),
                pl.BlockSpec((1, FEAT_PAD), lambda i, j, t: (0, 0)),           # bias
            ],
            out_specs=pl.BlockSpec((dst_tile, FEAT_PAD), lambda i, j, t: (i, 0)),
            scratch_shapes=[
                pltpu.VMEM((dst_tile, heads), jnp.float32),     # running max m
                pltpu.VMEM((dst_tile, heads), jnp.float32),     # running sum l
                pltpu.VMEM((dst_tile, FEAT_PAD), jnp.float32),  # output accumulator
            ],
        ),
        compiler_params=pltpu.CompilerParams(
            dimension_semantics=("parallel", "arbitrary"),
            vmem_limit_bytes=_VMEM_LIMIT),
    )(eff_tbl, a_dst, a_srcT, h_pad, adj_i8, b_pad)
    return out_pad


def gatnet_forward(x, edge_index, params, *, dst_tile=512, src_tile=512,
                   mxu_dtype=jnp.bfloat16, approx_recip=True):
    """GATNET forward (eval mode: all F.dropout(p=0.6) are identity)."""
    n, _ = x.shape
    heads = params["heads"]
    out_dim = params["out_dim"]

    # 512x512 defaults sit near the HBM roofline on v5e/v6e/v7x; cap for tiny graphs so
    # padding overhead stays bounded (and keep n_pad/dst_tile >= 4 on v7x when possible
    # so the "parallel" dst axis load-balances across both TensorCores).
    cap = _round_up(n, 128)
    dst_tile = min(dst_tile, cap)
    src_tile = min(src_tile, cap)

    tile_lcm = math.lcm(dst_tile, src_tile)
    n_pad = _round_up(max(n, tile_lcm), tile_lcm)

    x_pad = jnp.zeros((n_pad, x.shape[1]), jnp.float32).at[:n, :].set(x)

    # int8 0/1 adjacency (half the bf16 additive-bias traffic); self-loops for every
    # (incl. padded) node, as PyG does by default.  Built once, shared by BOTH layers.
    src_idx, dst_idx = edge_index[0], edge_index[1]
    adj = jnp.zeros((n_pad, n_pad), jnp.int8).at[dst_idx, src_idx].set(1)
    diag = jnp.arange(n_pad)
    adj = adj.at[diag, diag].set(1)

    # Per-(dst-tile, src-tile) effective-source-block table:
    #   eff[i, j] = j                  if block (i, j) contains an edge
    #             = last live j' <= j  otherwise (empty block: compute skipped, DMA
    #                                  remapped so consecutive empties are not fetched).
    ni, nj = n_pad // dst_tile, n_pad // src_tile
    blk = jnp.any((adj != 0).reshape(ni, dst_tile, nj, src_tile), axis=(1, 3))
    idx = jnp.where(blk, jnp.arange(nj, dtype=jnp.int32)[None, :], -1)
    eff_tbl = jnp.maximum(lax.cummax(idx, axis=1), 0).astype(jnp.int32).reshape(-1)

    x1 = gat_conv(x_pad, adj, eff_tbl,
                  params["w1"], params["asrc1"], params["adst1"], params["b1"],
                  heads=heads, out_dim=out_dim, concat=True, apply_elu=True,
                  dst_tile=dst_tile, src_tile=src_tile, mxu_dtype=mxu_dtype,
                  out_dtype=jnp.bfloat16, approx_recip=approx_recip)
    # x1 is lane-padded to FEAT_PAD and stored bf16 (it only feeds bf16 MXU matmuls);
    # layer-2 weights get zero-padded rows inside gat_conv, so no re-layout is needed.
    x2 = gat_conv(x1, adj, eff_tbl,
                  params["w2"], params["asrc2"], params["adst2"], params["b2"],
                  heads=1, out_dim=out_dim, concat=False, apply_elu=False,
                  dst_tile=dst_tile, src_tile=src_tile, mxu_dtype=mxu_dtype,
                  out_dtype=jnp.float32, approx_recip=approx_recip)
    return x2[:n, :out_dim]


if __name__ == "__main__":
    N, in_dim, out_dim, heads = 200, 8, 8, 4

    key = jax.random.PRNGKey(0)
    keys = jax.random.split(key, 9)

    x = jax.random.normal(keys[0], (N, in_dim), jnp.float32)

    # Two disconnected bidirectional path components (nodes 0..99 and 130..199); nodes
    # 100..129 keep only their self-loop.  With 128-node tiles the off-diagonal
    # (dst, src) blocks are completely empty, exercising the block-skip / DMA-remap path.
    a1 = jnp.arange(0, 99)
    a2 = jnp.arange(130, 199)
    src = jnp.concatenate([a1, a1 + 1, a2, a2 + 1])
    dst = jnp.concatenate([a1 + 1, a1, a2 + 1, a2])
    edge_index = jnp.stack([src, dst])            # [2, 336]

    # Layer 1: GATConv(in_dim, out_dim, heads=heads, concat=True)
    w1 = 0.1 * jax.random.normal(keys[1], (in_dim, heads * out_dim), jnp.float32)
    asrc1 = 0.1 * jax.random.normal(keys[2], (heads, out_dim), jnp.float32)
    adst1 = 0.1 * jax.random.normal(keys[3], (heads, out_dim), jnp.float32)
    b1 = 0.1 * jax.random.normal(keys[4], (heads * out_dim,), jnp.float32)

    # Layer 2: GATConv(heads*out_dim, out_dim, heads=1, concat=False)
    w2 = 0.1 * jax.random.normal(keys[5], (heads * out_dim, out_dim), jnp.float32)
    asrc2 = 0.1 * jax.random.normal(keys[6], (1, out_dim), jnp.float32)
    adst2 = 0.1 * jax.random.normal(keys[7], (1, out_dim), jnp.float32)
    b2 = 0.1 * jax.random.normal(keys[8], (out_dim,), jnp.float32)

    params = dict(w1=w1, asrc1=asrc1, adst1=adst1, b1=b1,
                  w2=w2, asrc2=asrc2, adst2=adst2, b2=b2,
                  heads=heads, out_dim=out_dim)

    # Multi-tile run (2x2 attention grid: exercises the online-softmax reduction over
    # src tiles, the empty-block skip, and the prefetched DMA-remap table).
    out_small = gatnet_forward(x, edge_index, params, dst_tile=128, src_tile=128)
    jax.block_until_ready(out_small)

    # Default (large-tile) configuration — a single attention block for this tiny graph.
    out_big = gatnet_forward(x, edge_index, params)
    jax.block_until_ready(out_big)

    assert out_small.shape == (N, out_dim) and out_big.shape == (N, out_dim)
    assert bool(jnp.all(jnp.isfinite(out_small)))
    assert bool(jnp.all(jnp.isfinite(out_big)))
    # Different tilings / reduction orders must agree (bf16 matmuls -> loose tolerance).
    assert bool(jnp.allclose(out_small, out_big, atol=5e-2, rtol=5e-2))
    print("KERNEL_OK")
</pallas_src>

<mosaic_0001>
module attributes {stable_mosaic.version = 11 : i64} {
  func.func @_gat_proj_kernel(%arg0: i32, %arg1: memref<256x8xf32, #tpu.memory_space<vmem>>, %arg2: memref<8x128xbf16, #tpu.memory_space<vmem>>, %arg3: memref<128x8xbf16, #tpu.memory_space<vmem>>, %arg4: memref<256x128xbf16, #tpu.memory_space<vmem>>, %arg5: memref<256x8xf32, #tpu.memory_space<vmem>>) attributes {dimension_semantics = [#tpu.dimension_semantics<parallel>], iteration_bounds = array<i64: 1>, scalar_prefetch = 0 : i64, scratch_operands = 0 : i64, tpu.core_type = #tpu.core_type<tc>, window_params = [{transform_indices = @transform_0, window_bounds = array<i64: 256, 8>}, {pipeline_mode = #tpu.pipeline_mode<synchronous>, transform_indices = @transform_1, window_bounds = array<i64: 8, 128>}, {pipeline_mode = #tpu.pipeline_mode<synchronous>, transform_indices = @transform_2, window_bounds = array<i64: 128, 8>}, {transform_indices = @transform_3, window_bounds = array<i64: 256, 128>}, {transform_indices = @transform_4, window_bounds = array<i64: 256, 8>}]} {
    %c0 = arith.constant 0 : index
    %c0_0 = arith.constant 0 : index
    %0 = vector.load %arg1[%c0, %c0_0] : memref<256x8xf32, #tpu.memory_space<vmem>>, vector<256x8xf32>
    %1 = arith.truncf %0 : vector<256x8xf32> to vector<256x8xbf16>
    %c0_1 = arith.constant 0 : index
    %c0_2 = arith.constant 0 : index
    %2 = vector.load %arg2[%c0_1, %c0_2] : memref<8x128xbf16, #tpu.memory_space<vmem>>, vector<8x128xbf16>
    %cst = arith.constant dense<0.000000e+00> : vector<256x128xf32>
    %3 = tpu.matmul %1, %2, %cst {dimension_numbers = #tpu.dot_dimension_numbers<[1], [0], [0], [1], [0, 0, 1, 1], [], []>} : vector<256x8xbf16>, vector<8x128xbf16>, vector<256x128xf32> -> vector<256x128xf32>
    %4 = arith.truncf %3 : vector<256x128xf32> to vector<256x128xbf16>
    %c0_3 = arith.constant 0 : index
    %c0_4 = arith.constant 0 : index
    %5 = vector.load %arg3[%c0_3, %c0_4] : memref<128x8xbf16, #tpu.memory_space<vmem>>, vector<128x8xbf16>
    %cst_5 = arith.constant dense<0.000000e+00> : vector<256x8xf32>
    %6 = tpu.matmul %4, %5, %cst_5 {dimension_numbers = #tpu.dot_dimension_numbers<[1], [0], [0], [1], [0, 0, 1, 1], [], []>} : vector<256x128xbf16>, vector<128x8xbf16>, vector<256x8xf32> -> vector<256x8xf32>
    %7 = arith.truncf %3 : vector<256x128xf32> to vector<256x128xbf16>
    %c0_6 = arith.constant 0 : index
    %c0_7 = arith.constant 0 : index
    %8 = vector.load %arg4[%c0_6, %c0_7] : memref<256x128xbf16, #tpu.memory_space<vmem>>, vector<256x128xbf16>
    tpu.vector_store %arg4[%c0_6, %c0_7], %7 {strides = array<i32>} : memref<256x128xbf16, #tpu.memory_space<vmem>>, vector<256x128xbf16>,
    %c0_8 = arith.constant 0 : index
    %c0_9 = arith.constant 0 : index
    %9 = vector.load %arg5[%c0_8, %c0_9] : memref<256x8xf32, #tpu.memory_space<vmem>>, vector<256x8xf32>
    tpu.vector_store %arg5[%c0_8, %c0_9], %6 {strides = array<i32>} : memref<256x8xf32, #tpu.memory_space<vmem>>, vector<256x8xf32>,
    return
  }
  func.func @transform_0(%arg0: i32) -> (i32, i32) {
    %c0_i32 = arith.constant 0 : i32
    %c0_i32_0 = arith.constant 0 : i32
    return %arg0, %c0_i32 : i32, i32
  }
  func.func @transform_1(%arg0: i32) -> (i32, i32) {
    %c0_i32 = arith.constant 0 : i32
    %c0_i32_0 = arith.constant 0 : i32
    %c0_i32_1 = arith.constant 0 : i32
    return %c0_i32, %c0_i32_0 : i32, i32
  }
  func.func @transform_2(%arg0: i32) -> (i32, i32) {
    %c0_i32 = arith.constant 0 : i32
    %c0_i32_0 = arith.constant 0 : i32
    %c0_i32_1 = arith.constant 0 : i32
    return %c0_i32, %c0_i32_0 : i32, i32
  }
  func.func @transform_3(%arg0: i32) -> (i32, i32) {
    %c0_i32 = arith.constant 0 : i32
    %c0_i32_0 = arith.constant 0 : i32
    return %arg0, %c0_i32 : i32, i32
  }
  func.func @transform_4(%arg0: i32) -> (i32, i32) {
    %c0_i32 = arith.constant 0 : i32
    %c0_i32_0 = arith.constant 0 : i32
    return %arg0, %c0_i32 : i32, i32
  }
}

</mosaic_0001>

<bundles_post_ra>
// kernel: tpu_custom_call.1
= control target key start
LH: loop header
LB: loop body
LE: loop exit
PB: predicated region body
PF: predicated region fallthrough
CT: control target
= control target key end

     0   :  { %vm116_vm0 = vcmask 1043456   ;;  %vm67_vm1 = vcmask 64512   ;;  %s1383_s0 = inlined_call_operand.vmem [shape: f32[256,8], index: 0, kind: input, shape index: {}]   ;;  %s1384_s1 = inlined_call_operand.vmem [shape: bf16[8,128], index: 1, kind: input, shape index: {}]   ;;  %s1385_s2 = inlined_call_operand.vmem [shape: bf16[128,8], index: 2, kind: input, shape index: {}]   ;;  %s1386_s3 = inlined_call_operand.hbm [shape: bf16[256,128], index: 3, kind: output, shape index: {0}]   ;;  %s1387_s4 = inlined_call_operand.vmem [shape: f32[256,8], index: 4, kind: output, shape index: {1}]  }
   0x1   :  { %v66_v0 = vld [vmem:[%s1384_s1] sm:$0xf]  ;;  %v19_v2 = vld [vmem:[%s1383_s0 + $0x8] sm:$0xff]  ;;  %v20_v5 = vld [vmem:[%s1383_s0 + $0x10] sm:$0xff] }
   0x2   :  { %v18_v1 = vld [vmem:[%s1383_s0] sm:$0xff]  ;;  %1040 = vmatprep.subr.msk.bf16.mxu0 %vm116_vm0, %v66_v0  ;;  %v118_v3 = vsel %vm116_vm0, %v66_v0, 0  ;;  %v21_v6 = vld [vmem:[%s1383_s0 + $0x18] sm:$0xff]  ;;  %v23_v9 = vld [vmem:[%s1383_s0 + $0x28] sm:$0xff] }
   0x3   :  { %v50_v4 = vpack.c.bf16 %v19_v2, %v18_v1  ;;  %v22_v7 = vld [vmem:[%s1383_s0 + $0x20] sm:$0xff]  ;;  %943 = vmatpush3.bf16.msra.mxu0 %v118_v3  ;;  %v51_v8 = vpack.c.bf16 %v21_v6, %v20_v5  ;;  %v24_v11 = vld [vmem:[%s1383_s0 + $0x30] sm:$0xff]  ;;  %v25_v12 = vld [vmem:[%s1383_s0 + $0x38] sm:$0xff] }
   0x4   :  { %v52_v10 = vpack.c.bf16 %v23_v9, %v22_v7  ;;  %v26_v13 = vld [vmem:[%s1383_s0 + $0x40] sm:$0xff]  ;;  %v27_v14 = vld [vmem:[%s1383_s0 + $0x48] sm:$0xff]  ;;  %v53_v15 = vpack.c.bf16 %v25_v12, %v24_v11  ;;  %v28_v18 = vld [vmem:[%s1383_s0 + $0x50] sm:$0xff] }
   0x5   :  { %944 = vmatprep.mubr.msk.bf16.mxu0 %vm67_vm1, %v50_v4  ;;  %v54_v16 = vpack.c.bf16 %v27_v14, %v26_v13  ;;  %v1044_v17 = vld [vmem:[%s1385_s2] sm:$0xff]   ;;  %v29_v19 = vld [vmem:[%s1383_s0 + $0x58] sm:$0xff]  ;;  %v1045_v20 = vld [vmem:[%s1385_s2 + $0x8] sm:$0xff]  }
   0x6   :  { %945 = vmatmul.mubr.msk.bf16.vlgmr.msra.gmra.mrb[0].mxu0 %vm67_vm1, %v51_v8  ;;  %v30_v21 = vld [vmem:[%s1383_s0 + $0x60] sm:$0xff]  ;;  %976 = vmatprep.subr.bf16.mxu0 %v1044_v17  ;;  %v31_v22 = vld [vmem:[%s1383_s0 + $0x68] sm:$0xff]  ;;  %v1046_v23 = vld [vmem:[%s1385_s2 + $0x10] sm:$0xff]   ;;  %v55_v24 = vpack.c.bf16 %v29_v19, %v28_v18 }
   0x7   :  { %948 = vmatprep.mubr.msk.bf16.mxu0 %vm67_vm1, %v52_v10  ;;  %977 = vmatpush3.bf16.msra.mxu0 %v1044_v17  ;;  %v56_v25 = vpack.c.bf16 %v31_v22, %v30_v21 }
   0x8   :  { %978 = vmatprep.subr.bf16.mxu0 %v1045_v20  ;;  %1024 = vmatprep.subr.bf16.mxu1 %v1044_v17 }
   0x9   :  { %1032 = vmatpush3.bf16.msra.mxu1 %v1044_v17 }
   0xa   :  { %1025 = vmatprep.subr.bf16.mxu1 %v1045_v20 }
   0xb   :  { %979 = vmatpush3.bf16.msra.mxu0 %v1045_v20 }
   0xe   :  { %949 = vmatmul.mubr.msk.bf16.gmra.mrb[4].mxu0 %vm67_vm1, %v53_v15 }
   0xf   :  { %952 = vmatprep.mubr.msk.bf16.mxu0 %vm67_vm1, %v54_v16 }
  0x10   :  { %10 = vsyncpa [#allocation3], 0  ;;  %980 = vmatprep.subr.bf16.mxu0 %v1046_v23  ;;  %v1047_v26 = vld [vmem:[%s1385_s2 + $0x18] sm:$0xff]   ;;  %1033 = vmatpush3.bf16.msra.mxu1 %v1045_v20  ;;  %v32_v27 = vld [vmem:[%s1383_s0 + $0x70] sm:$0xff] }
  0x11   :  { %1026 = vmatprep.subr.bf16.mxu1 %v1046_v23  ;;  %v33_v28 = vld [vmem:[%s1383_s0 + $0x78] sm:$0xff]  ;;  %981 = vmatpush3.bf16.msra.mxu0 %v1046_v23  ;;  %v34_v29 = vld [vmem:[%s1383_s0 + $0x80] sm:$0xff]  ;;  %v35_v30 = vld [vmem:[%s1383_s0 + $0x88] sm:$0xff] }
  0x12   :  { %982 = vmatprep.subr.bf16.mxu0 %v1047_v26  ;;  %v1048_v31 = vld [vmem:[%s1385_s2 + $0x20] sm:$0xff]   ;;  %v57_v32 = vpack.c.bf16 %v33_v28, %v32_v27  ;;  %v58_v33 = vpack.c.bf16 %v35_v30, %v34_v29  ;;  %v1049_v34 = vld [vmem:[%s1385_s2 + $0x28] sm:$0xff]   ;;  %v36_v35 = vld [vmem:[%s1383_s0 + $0x90] sm:$0xff] }
  0x13   :  { %v37_v36 = vld [vmem:[%s1383_s0 + $0x98] sm:$0xff]  ;;  %v38_v37 = vld [vmem:[%s1383_s0 + $0xa0] sm:$0xff]  ;;  %v39_v38 = vld [vmem:[%s1383_s0 + $0xa8] sm:$0xff] }
  0x14   :  { %1034 = vmatpush3.bf16.msra.mxu1 %v1046_v23  ;;  %v1050_v39 = vld [vmem:[%s1385_s2 + $0x30] sm:$0xff]   ;;  %v59_v40 = vpack.c.bf16 %v37_v36, %v36_v35  ;;  %v60_v41 = vpack.c.bf16 %v39_v38, %v38_v37  ;;  %v41_v43 = vld [vmem:[%s1383_s0 + $0xb8] sm:$0xff]  ;;  %v42_v44 = vld [vmem:[%s1383_s0 + $0xc0] sm:$0xff] }
  0x15   :  { %1027 = vmatprep.subr.bf16.mxu1 %v1047_v26  ;;  %983 = vmatpush3.bf16.msra.mxu0 %v1047_v26  ;;  %v40_v42 = vld [vmem:[%s1383_s0 + $0xb0] sm:$0xff]  ;;  %v43_v45 = vld [vmem:[%s1383_s0 + $0xc8] sm:$0xff]  ;;  %v45_v49 = vld [vmem:[%s1383_s0 + $0xd8] sm:$0xff] }
  0x16   :  { %953 = vmatmul.mubr.msk.bf16.gmra.mrb[8].mxu0 %vm67_vm1, %v55_v24  ;;  %984 = vmatprep.subr.bf16.mxu0 %v1048_v31  ;;  %v61_v46 = vpack.c.bf16 %v41_v43, %v40_v42  ;;  %v62_v47 = vpack.c.bf16 %v43_v45, %v42_v44  ;;  %v44_v48 = vld [vmem:[%s1383_s0 + $0xd0] sm:$0xff]  ;;  %v46_v50 = vld [vmem:[%s1383_s0 + $0xe0] sm:$0xff]  ;;  %v47_v51 = vld [vmem:[%s1383_s0 + $0xe8] sm:$0xff] }
  0x17   :  { %956 = vmatprep.mubr.msk.bf16.mxu0 %vm67_vm1, %v56_v25  ;;  %v63_v52 = vpack.c.bf16 %v45_v49, %v44_v48  ;;  %v64_v53 = vpack.c.bf16 %v47_v51, %v46_v50  ;;  %v48_v54 = vld [vmem:[%s1383_s0 + $0xf0] sm:$0xff]  ;;  %v49_v55 = vld [vmem:[%s1383_s0 + $0xf8] sm:$0xff]  ;;  %s1076_s0 = smov [#allocation2]  }
  0x18   :  { %1035 = vmatpush3.bf16.msra.mxu1 %v1047_v26  ;;  %v65_v56 = vpack.c.bf16 %v49_v55, %v48_v54  ;;  %v1051_v57 = vld [vmem:[%s1385_s2 + $0x38] sm:$0xff]   ;;  %s703_s2 = sshll.u32 %s1076_s0, 4  ;;  %s704_s2 = int_to_ptr.vmem [resolvable:$true] %s703_s2 }
  0x19   :  { %1028 = vmatprep.subr.bf16.mxu1 %v1048_v31  ;;  %985 = vmatpush3.bf16.msra.mxu0 %v1048_v31  ;;  %s1052_s16 = scalar_lea.vmem %s704_s2, 2048  ;;  %p1057_p1 = scmp.lt.s32.totalorder %s704_s2, %s704_s2 }
  0x1a   :  { %986 = vmatprep.subr.bf16.mxu0 %v1049_v34  ;;  %p1053_p0 = scmp.ne.s32.totalorder %s704_s2, %s1052_s16  ;;  %p1058_p2 = scmp.lt.s32.totalorder %s1052_s16, %s1052_s16 }
  0x1c   :  { %1036 = vmatpush3.bf16.msra.mxu1 %v1048_v31  ;;  %p1059_p3 = por %p1058_p2, %p1057_p1 }
  0x1d   :  { %1029 = vmatprep.subr.bf16.mxu1 %v1049_v34  ;;  %987 = vmatpush3.bf16.msra.mxu0 %v1049_v34 }
  0x1e   :  { %957 = vmatmul.mubr.msk.bf16.gmra.mrb[12].mxu0 %vm67_vm1, %v57_v32  ;;  %988 = vmatprep.subr.bf16.mxu0 %v1050_v39  ;;  %p1060_p4 = pnand %p1059_p3, %p1053_p0 }
  0x1f   :  { %960 = vmatprep.mubr.msk.bf16.mxu0 %vm67_vm1, %v58_v33 }
  0x20   :  { %1037 = vmatpush3.bf16.msra.mxu1 %v1049_v34 }
  0x21   :  { %1030 = vmatprep.subr.bf16.mxu1 %v1050_v39  ;;  %989 = vmatpush3.bf16.msra.mxu0 %v1050_v39 }
  0x22   :  { %990 = vmatprep.subr.bf16.mxu0 %v1051_v57 }
  0x24   :  { %1038 = vmatpush3.bf16.msra.mxu1 %v1050_v39 }
  0x25   :  { %1031 = vmatprep.subr.bf16.mxu1 %v1051_v57  ;;  %991 = vmatpush3.bf16.msra.mxu0 %v1051_v57 }
  0x26   :  { %961 = vmatmul.mubr.msk.bf16.gmra.mrb[16].mxu0 %vm67_vm1, %v59_v40 }
  0x27   :  { %964 = vmatprep.mubr.msk.bf16.mxu0 %vm67_vm1, %v60_v41 }
  0x28   :  { %1039 = vmatpush3.bf16.msra.mxu1 %v1051_v57 }
  0x2e   :  { %965 = vmatmul.mubr.msk.bf16.gmra.mrb[20].mxu0 %vm67_vm1, %v61_v46 }
  0x2f   :  { %968 = vmatprep.mubr.msk.bf16.mxu0 %vm67_vm1, %v62_v47 }
  0x36   :  { %969 = vmatmul.mubr.msk.bf16.gmra.mrb[24].mxu0 %vm67_vm1, %v63_v52 }
  0x37   :  { %972 = vmatprep.mubr.msk.bf16.mxu0 %vm67_vm1, %v64_v53 }
  0x3e   :  { %973 = vmatmul.mubr.msk.bf16.gmra.mrb[28].mxu0 %vm67_vm1, %v65_v56 }
  0xd9   :  { %v946_v58 = vpop.f32.mrb[0].mxu0 }
  0xda   :  { %v154_v59 = vpop.f32.mrb[1].mxu0 }
  0xdb   :  { %v947_v60 = vpop.f32.mrb[2].mxu0 }
  0xdc   :  { %v282_v61 = vpack.c.bf16 %v947_v60, %v946_v58  ;;  %v157_v62 = vpop.f32.mrb[3].mxu0 }
  0xdd   :  { %v281_v63 = vpack.c.bf16 %v157_v62, %v154_v59 }
  0xde   :  { %886 = vst [vmem:[#allocation2 + $0x8] sm:$0xff] %v282_v61  }
  0xdf   :  { %810 = vst [vmem:[#allocation2] sm:$0xff] %v281_v63   ;;  %992 = vmatprep.mubr.bf16.mxu0 %v281_v63 }
  0xe0   :  { %993 = vmatmul.mubr.bf16.vlgmr.msra.gmra.mrb[32].mxu0 %v282_v61 }
  0xe1   :  { %v950_v0 = vpop.f32.mrb[4].mxu0 }
  0xe2   :  { %v170_v1 = vpop.f32.mrb[5].mxu0 }
  0xe3   :  { %v951_v2 = vpop.f32.mrb[6].mxu0 }
  0xe4   :  { %v284_v3 = vpack.c.bf16 %v951_v2, %v950_v0  ;;  %v173_v4 = vpop.f32.mrb[7].mxu0 }
  0xe5   :  { %v283_v5 = vpack.c.bf16 %v173_v4, %v170_v1 }
  0xe6   :  { %888 = vst [vmem:[#allocation2 + $0x18] sm:$0xff] %v284_v3  }
  0xe7   :  { %887 = vst [vmem:[#allocation2 + $0x10] sm:$0xff] %v283_v5   ;;  %996 = vmatprep.mubr.bf16.mxu1 %v283_v5 }
  0xe8   :  { %997 = vmatmul.mubr.bf16.vlgmr.msra.gmra.mrb[0].mxu1 %v284_v3 }
  0xe9   :  { %v954_v6 = vpop.f32.mrb[8].mxu0 }
  0xea   :  { %v186_v7 = vpop.f32.mrb[9].mxu0 }
  0xeb   :  { %v955_v8 = vpop.f32.mrb[10].mxu0 }
  0xec   :  { %v286_v9 = vpack.c.bf16 %v955_v8, %v954_v6  ;;  %v189_v10 = vpop.f32.mrb[11].mxu0 }
  0xed   :  { %v285_v11 = vpack.c.bf16 %v189_v10, %v186_v7 }
  0xee   :  { %890 = vst [vmem:[#allocation2 + $0x28] sm:$0xff] %v286_v9  }
  0xef   :  { %889 = vst [vmem:[#allocation2 + $0x20] sm:$0xff] %v285_v11   ;;  %1000 = vmatprep.mubr.bf16.mxu1 %v285_v11 }
  0xf0   :  { %1001 = vmatmul.mubr.bf16.gmra.mrb[4].mxu1 %v286_v9 }
  0xf1   :  { %v958_v12 = vpop.f32.mrb[12].mxu0 }
  0xf2   :  { %v202_v13 = vpop.f32.mrb[13].mxu0 }
  0xf3   :  { %v959_v14 = vpop.f32.mrb[14].mxu0 }
  0xf4   :  { %v288_v15 = vpack.c.bf16 %v959_v14, %v958_v12  ;;  %v205_v16 = vpop.f32.mrb[15].mxu0 }
  0xf5   :  { %v287_v17 = vpack.c.bf16 %v205_v16, %v202_v13 }
  0xf6   :  { %892 = vst [vmem:[#allocation2 + $0x38] sm:$0xff] %v288_v15  }
  0xf7   :  { %891 = vst [vmem:[#allocation2 + $0x30] sm:$0xff] %v287_v17   ;;  %1004 = vmatprep.mubr.bf16.mxu1 %v287_v17 }
  0xf8   :  { %1005 = vmatmul.mubr.bf16.gmra.mrb[8].mxu1 %v288_v15 }
  0xf9   :  { %v962_v18 = vpop.f32.mrb[16].mxu0 }
  0xfa   :  { %v218_v19 = vpop.f32.mrb[17].mxu0 }
  0xfb   :  { %v963_v20 = vpop.f32.mrb[18].mxu0 }
  0xfc   :  { %v290_v21 = vpack.c.bf16 %v963_v20, %v962_v18  ;;  %v221_v22 = vpop.f32.mrb[19].mxu0 }
  0xfd   :  { %v289_v23 = vpack.c.bf16 %v221_v22, %v218_v19 }
  0xfe   :  { %894 = vst [vmem:[#allocation2 + $0x48] sm:$0xff] %v290_v21  }
  0xff   :  { %893 = vst [vmem:[#allocation2 + $0x40] sm:$0xff] %v289_v23   ;;  %1008 = vmatprep.mubr.bf16.mxu1 %v289_v23 }
 0x100   :  { %1009 = vmatmul.mubr.bf16.gmra.mrb[12].mxu1 %v290_v21 }
 0x101   :  { %v966_v24 = vpop.f32.mrb[20].mxu0 }
 0x102   :  { %v234_v25 = vpop.f32.mrb[21].mxu0 }
 0x103   :  { %v967_v26 = vpop.f32.mrb[22].mxu0 }
 0x104   :  { %v292_v27 = vpack.c.bf16 %v967_v26, %v966_v24  ;;  %v237_v28 = vpop.f32.mrb[23].mxu0 }
 0x105   :  { %v291_v29 = vpack.c.bf16 %v237_v28, %v234_v25 }
 0x106   :  { %896 = vst [vmem:[#allocation2 + $0x58] sm:$0xff] %v292_v27  }
 0x107   :  { %895 = vst [vmem:[#allocation2 + $0x50] sm:$0xff] %v291_v29   ;;  %1012 = vmatprep.mubr.bf16.mxu1 %v291_v29 }
 0x108   :  { %1013 = vmatmul.mubr.bf16.gmra.mrb[16].mxu1 %v292_v27 }
 0x109   :  { %v970_v30 = vpop.f32.mrb[24].mxu0 }
 0x10a   :  { %v250_v31 = vpop.f32.mrb[25].mxu0 }
 0x10b   :  { %v971_v32 = vpop.f32.mrb[26].mxu0 }
 0x10c   :  { %v294_v33 = vpack.c.bf16 %v971_v32, %v970_v30  ;;  %v253_v34 = vpop.f32.mrb[27].mxu0 }
 0x10d   :  { %v293_v35 = vpack.c.bf16 %v253_v34, %v250_v31 }
 0x10e   :  { %898 = vst [vmem:[#allocation2 + $0x68] sm:$0xff] %v294_v33  }
 0x10f   :  { %897 = vst [vmem:[#allocation2 + $0x60] sm:$0xff] %v293_v35   ;;  %1016 = vmatprep.mubr.bf16.mxu1 %v293_v35 }
 0x110   :  { %1017 = vmatmul.mubr.bf16.gmra.mrb[20].mxu1 %v294_v33 }
 0x111   :  { %v974_v36 = vpop.f32.mrb[28].mxu0 }
 0x112   :  { %v266_v37 = vpop.f32.mrb[29].mxu0 }
 0x113   :  { %v975_v38 = vpop.f32.mrb[30].mxu0 }
 0x114   :  { %v296_v39 = vpack.c.bf16 %v975_v38, %v974_v36  ;;  %v269_v40 = vpop.f32.mrb[31].mxu0 }
 0x115   :  { %v295_v41 = vpack.c.bf16 %v269_v40, %v266_v37 }
 0x116   :  { %900 = vst [vmem:[#allocation2 + $0x78] sm:$0xff] %v296_v39  }
 0x117   :  { %899 = vst [vmem:[#allocation2 + $0x70] sm:$0xff] %v295_v41   ;;  %1020 = vmatprep.mubr.bf16.mxu1 %v295_v41 }
 0x118   :  { %1021 = vmatmul.mubr.bf16.gmra.mrb[24].mxu1 %v296_v39 }
 0x119   :  { %1063 = shalt.err (!%p1060_p4)
}
 0x11a   :  { %s1064_s19 = scalar_lea.hbm %s1386_s3, 2048 }
 0x11b   :  { %p1065_p5 = scmp.ne.s32.totalorder %s1386_s3, %s1064_s19  ;;  %p1068_p6 = scmp.lt.u32.totalorder %s1064_s19, %s1386_s3 }
 0x11d   :  { %p1070_p7 = pnand %p1068_p6, %p1065_p5 }
 0x11f   :  { %1073 = shalt.err (!%p1070_p7)
}
 0x120   :  { %s1077_s24 = smov 64   ;;  %s1078_s1 = smov 4  }
 0x121   :  { %709 = dma.vmem_to_hbm [thread:$0]  %s704_s2, 2048, %s1386_s3, [#allocation3], %s1077_s24, %s1077_s24, %s1078_s1  }
 0x1b3   :  { %v994_v42 = vpop.f32.mrb[32].mxu0 }
 0x1b4   :  { %668 = vst.msk [vmem:[%s1387_s4 + $0x10] sm:$0xff] %vm67_vm1, %v994_v42  ;;  %v395_v43 = vpop.f32.mrb[33].mxu0 }
 0x1b5   :  { %666 = vst.msk [vmem:[%s1387_s4] sm:$0xff] %vm67_vm1, %v395_v43  ;;  %v995_v44 = vpop.f32.mrb[34].mxu0 }
 0x1b6   :  { %669 = vst.msk [vmem:[%s1387_s4 + $0x18] sm:$0xff] %vm67_vm1, %v995_v44  ;;  %v398_v45 = vpop.f32.mrb[35].mxu0 }
 0x1b7   :  { %667 = vst.msk [vmem:[%s1387_s4 + $0x8] sm:$0xff] %vm67_vm1, %v398_v45 }
 0x1bb   :  { %v998_v46 = vpop.f32.mrb[0].mxu1 }
 0x1bc   :  { %672 = vst.msk [vmem:[%s1387_s4 + $0x30] sm:$0xff] %vm67_vm1, %v998_v46  ;;  %v411_v47 = vpop.f32.mrb[1].mxu1 }
 0x1bd   :  { %670 = vst.msk [vmem:[%s1387_s4 + $0x20] sm:$0xff] %vm67_vm1, %v411_v47  ;;  %v999_v48 = vpop.f32.mrb[2].mxu1 }
 0x1be   :  { %673 = vst.msk [vmem:[%s1387_s4 + $0x38] sm:$0xff] %vm67_vm1, %v999_v48  ;;  %v414_v49 = vpop.f32.mrb[3].mxu1 }
 0x1bf   :  { %671 = vst.msk [vmem:[%s1387_s4 + $0x28] sm:$0xff] %vm67_vm1, %v414_v49 }
 0x1c3   :  { %v1002_v50 = vpop.f32.mrb[4].mxu1 }
 0x1c4   :  { %676 = vst.msk [vmem:[%s1387_s4 + $0x50] sm:$0xff] %vm67_vm1, %v1002_v50  ;;  %v427_v51 = vpop.f32.mrb[5].mxu1 }
 0x1c5   :  { %674 = vst.msk [vmem:[%s1387_s4 + $0x40] sm:$0xff] %vm67_vm1, %v427_v51  ;;  %v1003_v52 = vpop.f32.mrb[6].mxu1 }
 0x1c6   :  { %677 = vst.msk [vmem:[%s1387_s4 + $0x58] sm:$0xff] %vm67_vm1, %v1003_v52  ;;  %v430_v53 = vpop.f32.mrb[7].mxu1 }
 0x1c7   :  { %675 = vst.msk [vmem:[%s1387_s4 + $0x48] sm:$0xff] %vm67_vm1, %v430_v53 }
 0x1cb   :  { %v1006_v54 = vpop.f32.mrb[8].mxu1 }
 0x1cc   :  { %680 = vst.msk [vmem:[%s1387_s4 + $0x70] sm:$0xff] %vm67_vm1, %v1006_v54  ;;  %v443_v55 = vpop.f32.mrb[9].mxu1 }
 0x1cd   :  { %678 = vst.msk [vmem:[%s1387_s4 + $0x60] sm:$0xff] %vm67_vm1, %v443_v55  ;;  %v1007_v56 = vpop.f32.mrb[10].mxu1 }
 0x1ce   :  { %681 = vst.msk [vmem:[%s1387_s4 + $0x78] sm:$0xff] %vm67_vm1, %v1007_v56  ;;  %v446_v57 = vpop.f32.mrb[11].mxu1 }
 0x1cf   :  { %679 = vst.msk [vmem:[%s1387_s4 + $0x68] sm:$0xff] %vm67_vm1, %v446_v57 }
 0x1d3   :  { %v1010_v58 = vpop.f32.mrb[12].mxu1 }
 0x1d4   :  { %684 = vst.msk [vmem:[%s1387_s4 + $0x90] sm:$0xff] %vm67_vm1, %v1010_v58  ;;  %v459_v59 = vpop.f32.mrb[13].mxu1 }
 0x1d5   :  { %682 = vst.msk [vmem:[%s1387_s4 + $0x80] sm:$0xff] %vm67_vm1, %v459_v59  ;;  %v1011_v60 = vpop.f32.mrb[14].mxu1 }
 0x1d6   :  { %685 = vst.msk [vmem:[%s1387_s4 + $0x98] sm:$0xff] %vm67_vm1, %v1011_v60  ;;  %v462_v61 = vpop.f32.mrb[15].mxu1 }
 0x1d7   :  { %683 = vst.msk [vmem:[%s1387_s4 + $0x88] sm:$0xff] %vm67_vm1, %v462_v61 }
 0x1db   :  { %v1014_v62 = vpop.f32.mrb[16].mxu1 }
 0x1dc   :  { %688 = vst.msk [vmem:[%s1387_s4 + $0xb0] sm:$0xff] %vm67_vm1, %v1014_v62  ;;  %v475_v63 = vpop.f32.mrb[17].mxu1 }
 0x1dd   :  { %686 = vst.msk [vmem:[%s1387_s4 + $0xa0] sm:$0xff] %vm67_vm1, %v475_v63  ;;  %v1015_v0 = vpop.f32.mrb[18].mxu1 }
 0x1de   :  { %689 = vst.msk [vmem:[%s1387_s4 + $0xb8] sm:$0xff] %vm67_vm1, %v1015_v0  ;;  %v478_v1 = vpop.f32.mrb[19].mxu1 }
 0x1df   :  { %687 = vst.msk [vmem:[%s1387_s4 + $0xa8] sm:$0xff] %vm67_vm1, %v478_v1 }
 0x1e3   :  { %v1018_v2 = vpop.f32.mrb[20].mxu1 }
 0x1e4   :  { %692 = vst.msk [vmem:[%s1387_s4 + $0xd0] sm:$0xff] %vm67_vm1, %v1018_v2  ;;  %v491_v3 = vpop.f32.mrb[21].mxu1 }
 0x1e5   :  { %690 = vst.msk [vmem:[%s1387_s4 + $0xc0] sm:$0xff] %vm67_vm1, %v491_v3  ;;  %v1019_v4 = vpop.f32.mrb[22].mxu1 }
 0x1e6   :  { %693 = vst.msk [vmem:[%s1387_s4 + $0xd8] sm:$0xff] %vm67_vm1, %v1019_v4  ;;  %v494_v5 = vpop.f32.mrb[23].mxu1 }
 0x1e7   :  { %691 = vst.msk [vmem:[%s1387_s4 + $0xc8] sm:$0xff] %vm67_vm1, %v494_v5 }
 0x1eb   :  { %v1022_v6 = vpop.f32.mrb[24].mxu1 }
 0x1ec   :  { %696 = vst.msk [vmem:[%s1387_s4 + $0xf0] sm:$0xff] %vm67_vm1, %v1022_v6  ;;  %v507_v7 = vpop.f32.mrb[25].mxu1 }
 0x1ed   :  { %694 = vst.msk [vmem:[%s1387_s4 + $0xe0] sm:$0xff] %vm67_vm1, %v507_v7  ;;  %v1023_v8 = vpop.f32.mrb[26].mxu1 }
 0x1ee   :  { %697 = vst.msk [vmem:[%s1387_s4 + $0xf8] sm:$0xff] %vm67_vm1, %v1023_v8  ;;  %v510_v9 = vpop.f32.mrb[27].mxu1 }
 0x1ef   :  { %695 = vst.msk [vmem:[%s1387_s4 + $0xe8] sm:$0xff] %vm67_vm1, %v510_v9 }
 0x1f0   :  { %1074 = dma.done.wait [#allocation3], 2048  }
 0x1f1   :  { %1075 = vsyncadd [#allocation3], 4294965248 }
 0x1f2   :  { %717 = vsyncpa [#allocation3], 1 }

</bundles_post_ra>
